<compile_context>
chip_gen: v6e
topology: v6e:2x2x1
jax: 0.10.0
libtpu: 0.0.40
codegen_flags: <defaults>
</compile_context>

<pallas_src>
import functools

import jax
import jax.numpy as jnp
from jax.experimental import pallas as pl
from jax.experimental.pallas import tpu as pltpu

BN_EPS = 1e-5


# ----------------------------------------------------------------------------
# Pallas kernels (everything is laid out feature-major with the tn points in lanes)
# ----------------------------------------------------------------------------
def fc1t_kernel(x_ref, w_ref, b_ref, o_ref, *, slope):
    """fc1 = Linear (BN folded) + LeakyReLU, transposed: [mid, in_ch] @ [in_ch, tn]."""
    y = jnp.dot(w_ref[...], x_ref[...], preferred_element_type=jnp.float32)
    y = y + b_ref[...]
    y = jnp.where(y >= 0.0, y, slope * y)
    o_ref[...] = y.astype(o_ref.dtype)


def kpconv_fused_kernel(rel_ref, feat_ref, xT_ref, kp_ref, kpw_ref, fc2b_ref, *rest,
                        inv_sigma, slope, k_nb, k_pts, mid, has_proj):
    """KPConv + fc2(Linear+BN+LeakyReLU) + projection(Linear+BN) + residual add.

    rel_ref  : [3, K_nb, tn]          neighbor - query coordinates (points in lanes)
    feat_ref : [K_nb*mid, tn]         gathered fc1 features, row block j*mid+c (lane-dense)
    xT_ref   : [in_ch, tn]            original block input, transposed (projection/residual)
    kp_ref   : [3, K_pts]   (SMEM)    kernel point coordinates
    kpw_ref  : [out_ch, K_pts*mid]    (kp_w_flat @ fc2_w_folded).T  — single fused weight
    fc2b_ref : [out_ch, 1]
    rest     : (projwT_ref [out_ch,in_ch], projbT_ref [out_ch,1],) o_ref [out_ch,tn], w2d scratch
    """
    if has_proj:
        projw_ref, projb_ref, o_ref, w2d_ref = rest
    else:
        o_ref, w2d_ref = rest

    rx = rel_ref[0]                                   # [K_nb, tn]
    ry = rel_ref[1]
    rz = rel_ref[2]

    # ---- per-kernel-point influences + VPU neighbor contraction (all lane-dense) ----
    for kk in range(k_pts):
        dx = rx - kp_ref[0, kk]                       # scalar from SMEM, broadcast on VPU
        dy = ry - kp_ref[1, kk]
        dz = rz - kp_ref[2, kk]
        d = jnp.sqrt(dx * dx + dy * dy + dz * dz)
        infl = jnp.maximum(1.0 - d * inv_sigma, 0.0)  # [K_nb, tn]

        # weighted_k[c, n] = sum_j infl[j, n] * feat[j*mid + c, n]
        acc = feat_ref[0:mid, :] * infl[0:1, :]
        for j in range(1, k_nb):
            acc = acc + feat_ref[j * mid:(j + 1) * mid, :] * infl[j:j + 1, :]
        w2d_ref[kk * mid:(kk + 1) * mid, :] = acc     # written straight into the scratch

    # ---- ONE lane-dense matmul: fused (kernel-point weights @ fc2) ----
    y = jnp.dot(kpw_ref[...], w2d_ref[...], preferred_element_type=jnp.float32)
    y = y + fc2b_ref[...]
    y = jnp.where(y >= 0.0, y, slope * y)             # fc2 LeakyReLU

    # ---- projection (identity activation) + residual add ----
    if has_proj:
        p = jnp.dot(projw_ref[...], xT_ref[...], preferred_element_type=jnp.float32)
        p = p + projb_ref[...]
    else:
        p = xT_ref[...].astype(jnp.float32)
    o_ref[...] = (p + y).astype(o_ref.dtype)


# ----------------------------------------------------------------------------
# Pallas wrappers
# ----------------------------------------------------------------------------
def fc1_layer_t(x_t, w_t, b, *, slope, tn=256):
    """x_t [cin, N_pad] -> [cout, N_pad]; lane-dense output (no masked narrow stores)."""
    cin, n_pad = x_t.shape
    cout = w_t.shape[0]
    assert n_pad % tn == 0
    kern = functools.partial(fc1t_kernel, slope=slope)
    return pl.pallas_call(
        kern,
        out_shape=jax.ShapeDtypeStruct((cout, n_pad), x_t.dtype),
        grid=(n_pad // tn,),
        in_specs=[
            pl.BlockSpec((cin, tn), lambda i: (0, i)),
            pl.BlockSpec((cout, cin), lambda i: (0, 0)),
            pl.BlockSpec((cout, 1), lambda i: (0, 0)),
        ],
        out_specs=pl.BlockSpec((cout, tn), lambda i: (0, i)),
        compiler_params=pltpu.CompilerParams(dimension_semantics=("parallel",)),
    )(x_t, w_t, b)


def kpconv_fused(rel_t, feat_t, x_t, kp_t, kpw_fc2_t, fc2_b, proj_w_t, proj_b_t,
                 *, inv_sigma, slope, tn=256):
    in_ch, n_pad = x_t.shape
    k_nb = rel_t.shape[1]
    k_pts = kp_t.shape[1]
    out_ch = kpw_fc2_t.shape[0]
    mid = kpw_fc2_t.shape[1] // k_pts
    has_proj = proj_w_t is not None
    assert n_pad % tn == 0
    assert feat_t.shape == (k_nb * mid, n_pad)

    kern = functools.partial(kpconv_fused_kernel, inv_sigma=inv_sigma, slope=slope,
                             k_nb=k_nb, k_pts=k_pts, mid=mid, has_proj=has_proj)

    in_specs = [
        pl.BlockSpec((3, k_nb, tn), lambda i: (0, 0, i)),              # rel (points in lanes)
        pl.BlockSpec((k_nb * mid, tn), lambda i: (0, i)),              # gathered fc1 features
        pl.BlockSpec((in_ch, tn), lambda i: (0, i)),                   # original input (T)
        pl.BlockSpec(memory_space=pltpu.MemorySpace.SMEM),             # kernel points [3,K_pts]
        pl.BlockSpec((out_ch, k_pts * mid), lambda i: (0, 0)),         # fused kpw @ fc2 (T)
        pl.BlockSpec((out_ch, 1), lambda i: (0, 0)),                   # fc2 bias
    ]
    args = [rel_t, feat_t, x_t, kp_t, kpw_fc2_t, fc2_b]
    if has_proj:
        in_specs += [
            pl.BlockSpec((out_ch, in_ch), lambda i: (0, 0)),
            pl.BlockSpec((out_ch, 1), lambda i: (0, 0)),
        ]
        args += [proj_w_t, proj_b_t]

    return pl.pallas_call(
        kern,
        out_shape=jax.ShapeDtypeStruct((out_ch, n_pad), x_t.dtype),
        grid=(n_pad // tn,),
        in_specs=in_specs,
        out_specs=pl.BlockSpec((out_ch, tn), lambda i: (0, i)),
        scratch_shapes=[pltpu.VMEM((k_pts * mid, tn), jnp.float32)],
        compiler_params=pltpu.CompilerParams(dimension_semantics=("parallel",)),
    )(*args)


# ----------------------------------------------------------------------------
# Plain-JAX glue: ball-query neighbors + gather (data-dependent indexing)
# ----------------------------------------------------------------------------
def ball_neighbors(coords, k, radius):
    n = coords.shape[0]
    d2 = jnp.sum((coords[:, None, :] - coords[None, :, :]) ** 2, axis=-1)
    within = d2 <= radius * radius
    masked = jnp.where(within, d2, jnp.inf)
    vals, idx = jax.lax.top_k(-masked, k)             # k smallest masked distances
    return jnp.where(jnp.isfinite(vals), idx, n)      # shadow neighbor index == n


def gather_neighbors_t(coords, feats_t, nb_idx):
    """coords [N,3]; feats_t [mid, N]; nb_idx [N, K_nb] (shadow == N).

    Returns lane-dense (points-in-lanes) tensors:
      rel_t  [3, K_nb, N]      neighbor - query coordinates
      feat_t [K_nb*mid, N]     gathered fc1 features, row block j*mid + c
    """
    n = coords.shape[0]
    mid = feats_t.shape[0]
    k_nb = nb_idx.shape[1]
    pad_c = jnp.concatenate([coords, jnp.full((1, 3), 1e6, coords.dtype)], axis=0)
    pad_f = jnp.concatenate([feats_t, jnp.zeros((mid, 1), feats_t.dtype)], axis=1)
    rel = pad_c[nb_idx] - coords[:, None, :]                    # [N, K_nb, 3]
    rel_t = jnp.transpose(rel, (2, 1, 0))                       # [3, K_nb, N]
    nb_f = jnp.take(pad_f, nb_idx, axis=1)                      # [mid, N, K_nb]
    feat_t = jnp.transpose(nb_f, (2, 0, 1)).reshape(k_nb * mid, n)
    return rel_t, feat_t


def fold_bn(w, b, bn, eps=BN_EPS):
    """Fold eval-mode BatchNorm1d(gamma, beta, mean, var) into Linear(w, b)."""
    gamma, beta, mean, var = bn
    scale = gamma / jnp.sqrt(var + eps)
    return w * scale[None, :], (b - mean) * scale + beta


# ----------------------------------------------------------------------------
# Parameters (deterministic synthetic init) and full forward
# ----------------------------------------------------------------------------
def init_params(key, in_ch, out_ch, point_influence, num_kpoints=15):
    mid = out_ch // 4

    def linear(kk, cin, cout):
        k1, k2 = jax.random.split(kk)
        bound = 1.0 / jnp.sqrt(cin)
        w = jax.random.uniform(k1, (cin, cout), jnp.float32, -bound, bound)
        b = jax.random.uniform(k2, (cout,), jnp.float32, -bound, bound)
        return w, b

    def bn(kk, c):
        k1, k2, k3, k4 = jax.random.split(kk, 4)
        gamma = jax.random.uniform(k1, (c,), jnp.float32, 0.8, 1.2)
        beta = 0.1 * jax.random.normal(k2, (c,), jnp.float32)
        mean = 0.1 * jax.random.normal(k3, (c,), jnp.float32)
        var = jax.random.uniform(k4, (c,), jnp.float32, 0.5, 1.5)
        return gamma, beta, mean, var

    keys = jax.random.split(key, 8)
    p = {}
    p["fc1_w"], p["fc1_b"] = linear(keys[0], in_ch, mid)
    p["fc1_bn"] = bn(keys[1], mid)
    p["fc2_w"], p["fc2_b"] = linear(keys[2], mid, out_ch)
    p["fc2_bn"] = bn(keys[3], out_ch)
    p["proj_w"], p["proj_b"] = linear(keys[4], in_ch, out_ch)
    p["proj_bn"] = bn(keys[5], out_ch)
    p["kp_w"] = jax.random.normal(keys[6], (num_kpoints, mid, mid), jnp.float32) * jnp.sqrt(2.0 / mid)
    dirs = jax.random.normal(keys[7], (num_kpoints, 3), jnp.float32)
    dirs = dirs / (jnp.linalg.norm(dirs, axis=1, keepdims=True) + 1e-9)
    p["kpoints"] = (dirs * (1.5 * point_influence)).at[0].set(0.0)
    return p


def kpconv_residual_block(coords, feats, params, *, point_influence, ball_radius,
                          k=34, slope=0.01, tn=256):
    n, in_ch = feats.shape
    out_ch = params["fc2_w"].shape[1]
    mid = params["fc1_w"].shape[1]
    k_pts = params["kpoints"].shape[0]

    # pad the point count to a multiple of the tile size (tail handling)
    n_pad = pl.cdiv(n, tn) * tn
    pad = n_pad - n
    if pad:
        coords_p = jnp.concatenate([coords, jnp.full((pad, 3), 1e6, coords.dtype)], 0)
        feats_p = jnp.concatenate([feats, jnp.zeros((pad, in_ch), feats.dtype)], 0)
    else:
        coords_p, feats_p = coords, feats

    # fold eval-mode BN into the linear layers once, on the host
    fc1_w, fc1_b = fold_bn(params["fc1_w"], params["fc1_b"], params["fc1_bn"])
    fc2_w, fc2_b = fold_bn(params["fc2_w"], params["fc2_b"], params["fc2_bn"])
    if in_ch != out_ch:
        proj_w, proj_b = fold_bn(params["proj_w"], params["proj_b"], params["proj_bn"])
        proj_w_t, proj_b_t = proj_w.T, proj_b.reshape(out_ch, 1)
    else:
        proj_w_t = proj_b_t = None

    # fold kernel-point weights and fc2 into ONE lane-dense matrix (exact, no nonlinearity)
    kpw_fc2_t = (params["kp_w"].reshape(k_pts * mid, mid) @ fc2_w).T     # [out_ch, K_pts*mid]

    x_t = feats_p.T                                    # [in_ch, N_pad] — points in lanes

    # fc1: Linear -> BN -> LeakyReLU (transposed Pallas kernel, lane-dense output)
    xres_t = fc1_layer_t(x_t, fc1_w.T, fc1_b.reshape(mid, 1), slope=slope, tn=tn)

    # ball-query neighbor search + gather (data-dependent glue in plain JAX)
    nb_idx = ball_neighbors(coords_p, k, ball_radius)
    rel_t, feat_t = gather_neighbors_t(coords_p, xres_t, nb_idx)

    # KPConv + fc2 + projection + residual, fused in one Pallas kernel
    out_t = kpconv_fused(rel_t, feat_t, x_t, params["kpoints"].T, kpw_fc2_t,
                         fc2_b.reshape(out_ch, 1), proj_w_t, proj_b_t,
                         inv_sigma=1.0 / point_influence, slope=slope, tn=tn)
    return out_t.T[:n]


# ----------------------------------------------------------------------------
# Pure-JAX reference (unfolded BN, unfused weights) for the correctness check
# ----------------------------------------------------------------------------
def reference_forward(coords, feats, params, *, point_influence, ball_radius,
                      k=34, slope=0.01):
    def fc(x, w, b, bn, act):
        gamma, beta, mean, var = bn
        y = x @ w + b
        y = (y - mean) / jnp.sqrt(var + BN_EPS) * gamma + beta
        return jnp.where(y >= 0, y, slope * y) if act else y

    in_ch = feats.shape[1]
    out_ch = params["fc2_w"].shape[1]

    x_res = fc(feats, params["fc1_w"], params["fc1_b"], params["fc1_bn"], True)
    nb_idx = ball_neighbors(coords, k, ball_radius)
    pad_c = jnp.concatenate([coords, jnp.full((1, 3), 1e6, coords.dtype)], 0)
    pad_f = jnp.concatenate([x_res, jnp.zeros((1, x_res.shape[1]), x_res.dtype)], 0)
    rel = pad_c[nb_idx] - coords[:, None, :]            # [N, K_nb, 3]
    nb_f = pad_f[nb_idx]                                # [N, K_nb, mid]
    d = jnp.sqrt(jnp.sum((rel[:, :, None, :] - params["kpoints"][None, None]) ** 2, -1))
    infl = jnp.maximum(1.0 - d / point_influence, 0.0)  # [N, K_nb, K_pts]
    weighted = jnp.einsum("njk,njc->nkc", infl, nb_f)
    x_res = jnp.einsum("nkc,kco->no", weighted, params["kp_w"])
    x_res = fc(x_res, params["fc2_w"], params["fc2_b"], params["fc2_bn"], True)
    if in_ch == out_ch:
        proj = feats
    else:
        proj = fc(feats, params["proj_w"], params["proj_b"], params["proj_bn"], False)
    return proj + x_res


# ----------------------------------------------------------------------------
if __name__ == "__main__":
    N, IN_CH, OUT_CH = 1000, 64, 128
    POINT_INFLUENCE, BALL_RADIUS, K_NB = 0.2, 0.4, 34

    key = jax.random.PRNGKey(0)
    kc, kf, kp = jax.random.split(key, 3)
    coords = jax.random.uniform(kc, (N, 3), jnp.float32)        # point cloud in [0,1]^3
    feats = jax.random.normal(kf, (N, IN_CH), jnp.float32)
    params = init_params(kp, IN_CH, OUT_CH, POINT_INFLUENCE)

    out = kpconv_residual_block(coords, feats, params,
                                point_influence=POINT_INFLUENCE,
                                ball_radius=BALL_RADIUS, k=K_NB)
    out = jax.block_until_ready(out)

    ref = reference_forward(coords, feats, params,
                            point_influence=POINT_INFLUENCE,
                            ball_radius=BALL_RADIUS, k=K_NB)
    assert out.shape == (N, OUT_CH)
    err = float(jnp.max(jnp.abs(out - ref)))
    assert jnp.allclose(out, ref, atol=5e-3, rtol=5e-3), err
    print("KERNEL_OK")
</pallas_src>

<mosaic_0001>
module attributes {stable_mosaic.version = 11 : i64} {
  func.func @fc1t_kernel(%arg0: i32, %arg1: memref<64x256xf32, #tpu.memory_space<vmem>>, %arg2: memref<32x64xf32, #tpu.memory_space<vmem>>, %arg3: memref<32x1xf32, #tpu.memory_space<vmem>>, %arg4: memref<32x256xf32, #tpu.memory_space<vmem>>) attributes {dimension_semantics = [#tpu.dimension_semantics<parallel>], iteration_bounds = array<i64: 4>, scalar_prefetch = 0 : i64, scratch_operands = 0 : i64, tpu.core_type = #tpu.core_type<tc>, window_params = [{transform_indices = @transform_0, window_bounds = array<i64: 64, 256>}, {pipeline_mode = #tpu.pipeline_mode<synchronous>, transform_indices = @transform_1, window_bounds = array<i64: 32, 64>}, {pipeline_mode = #tpu.pipeline_mode<synchronous>, transform_indices = @transform_2, window_bounds = array<i64: 32, 1>}, {transform_indices = @transform_3, window_bounds = array<i64: 32, 256>}]} {
    %c0 = arith.constant 0 : index
    %c0_0 = arith.constant 0 : index
    %0 = vector.load %arg2[%c0, %c0_0] : memref<32x64xf32, #tpu.memory_space<vmem>>, vector<32x64xf32>
    %c0_1 = arith.constant 0 : index
    %c0_2 = arith.constant 0 : index
    %1 = vector.load %arg1[%c0_1, %c0_2] : memref<64x256xf32, #tpu.memory_space<vmem>>, vector<64x256xf32>
    %cst = arith.constant dense<0.000000e+00> : vector<32x256xf32>
    %2 = tpu.matmul %0, %1, %cst {dimension_numbers = #tpu.dot_dimension_numbers<[1], [0], [0], [1], [0, 0, 1, 1], [], []>} : vector<32x64xf32>, vector<64x256xf32>, vector<32x256xf32> -> vector<32x256xf32>
    %c0_3 = arith.constant 0 : index
    %c0_4 = arith.constant 0 : index
    %3 = vector.load %arg3[%c0_3, %c0_4] : memref<32x1xf32, #tpu.memory_space<vmem>>, vector<32x1xf32>
    %4 = vector.broadcast %3 : vector<32x1xf32> to vector<32x256xf32>
    %5 = arith.addf %2, %4 : vector<32x256xf32>
    %cst_5 = arith.constant 0.000000e+00 : f32
    %6 = vector.broadcast %cst_5 : f32 to vector<32x256xf32>
    %7 = arith.cmpf oge, %5, %6 : vector<32x256xf32>
    %cst_6 = arith.constant 0.00999999977 : f32
    %8 = vector.broadcast %cst_6 : f32 to vector<32x256xf32>
    %9 = arith.mulf %8, %5 : vector<32x256xf32>
    %10 = arith.select %7, %5, %9 : vector<32x256xi1>, vector<32x256xf32>
    %c0_7 = arith.constant 0 : index
    %c0_8 = arith.constant 0 : index
    %11 = vector.load %arg4[%c0_7, %c0_8] : memref<32x256xf32, #tpu.memory_space<vmem>>, vector<32x256xf32>
    tpu.vector_store %arg4[%c0_7, %c0_8], %10 {strides = array<i32>} : memref<32x256xf32, #tpu.memory_space<vmem>>, vector<32x256xf32>,
    return
  }
  func.func @transform_0(%arg0: i32) -> (i32, i32) {
    %c0_i32 = arith.constant 0 : i32
    %c0_i32_0 = arith.constant 0 : i32
    return %c0_i32, %arg0 : i32, i32
  }
  func.func @transform_1(%arg0: i32) -> (i32, i32) {
    %c0_i32 = arith.constant 0 : i32
    %c0_i32_0 = arith.constant 0 : i32
    %c0_i32_1 = arith.constant 0 : i32
    return %c0_i32, %c0_i32_0 : i32, i32
  }
  func.func @transform_2(%arg0: i32) -> (i32, i32) {
    %c0_i32 = arith.constant 0 : i32
    %c0_i32_0 = arith.constant 0 : i32
    %c0_i32_1 = arith.constant 0 : i32
    return %c0_i32, %c0_i32_0 : i32, i32
  }
  func.func @transform_3(%arg0: i32) -> (i32, i32) {
    %c0_i32 = arith.constant 0 : i32
    %c0_i32_0 = arith.constant 0 : i32
    return %c0_i32, %arg0 : i32, i32
  }
}

</mosaic_0001>

<bundles_post_ra>
// kernel: tpu_custom_call.1
= control target key start
LH: loop header
LB: loop body
LE: loop exit
PB: predicated region body
PF: predicated region fallthrough
CT: control target
= control target key end

     0   :  { %8 = vsyncpa [#allocation3], 0  ;;  %s884_s0 = inlined_call_operand.hbm [shape: f32[64,1024], index: 0, kind: input, shape index: {}]   ;;  %s885_s1 = inlined_call_operand.vmem [shape: f32[32,64], index: 1, kind: input, shape index: {}]   ;;  %s886_s2 = inlined_call_operand.vmem [shape: f32[32,1], index: 2, kind: input, shape index: {}]   ;;  %s887_s3 = inlined_call_operand.hbm [shape: f32[32,1024], index: 3, kind: output, shape index: {}]  }
   0x1   :  { %10 = vsyncpa [#allocation3 + $0x1], 0 }
   0x2   :  { %11 = vsyncpa [#allocation4], 0 }
   0x3   :  { %13 = vsyncpa [#allocation4 + $0x1], 0  ;;  %s672_s12 = smov 0   ;;  %s674_s13 = smov 0  }
   0x4   :  { %s676_s14 = smov 0   ;;  %s678_s15 = smov 0  }
   0x5 LB: > { %s693_s16 = sadd.s32 4294967295, %s640_s15   ;;  %s456_s17 = sadd.s32 4294967294, %s640_s15   ;;  %s640_s15 = sphi %s678_s15, %s902_s15   ;;  %s636_s14 = sphi %s676_s14, %s901_s14   ;;  %s632_s13 = sphi %s674_s13, %s900_s13   ;;  %s628_s12 = sphi %s672_s12, %s899_s12  }
   0x6   : > { %s697_s18 = sadd.s32 1, %s640_s15   ;;  %s26_s19 = sadd.s32 1, %s636_s14 }
   0x7   : > { %s23_s20 = ssub.s32 %s640_s15, %s697_s18  ;;  %p33_p0 = scmp.ne.s32.totalorder %s636_s14, %s632_s13 }
   0x8   : > { %p24_p1 = scmp.eq.s32.totalorder %s23_s20, 0  ;;  %p34_p2 = scmp.eq.s32.totalorder %s640_s15, 0 }
   0x9   : > { %p39_p3 = scmp.ne.s32.totalorder %s632_s13, %s628_s12  ;;  %p40_p4 = scmp.eq.s32.totalorder %s693_s16, 0 }
   0xa   : > { %s709_s21 = scalar_select %p24_p1, %s636_s14, %s26_s19  }
   0xb   : > { %p711_p5 = por %p34_p2, %p33_p0  ;;  %p715_p6 = por %p40_p4, %p39_p3 }
   0xc   : > { %p105_p7 = scmp.eq.s32.totalorder %s693_s16, 3  ;;  %p111_p8 = scmp.eq.s32.totalorder %s456_s17, 3 }
   0xd   : > { %s891_s23 = scalar_select %p715_p6, 1, 0 }
   0xe   : > { %p504_p9 = scmp.lt.s32.totalorder %s640_s15, 4  ;;  %p721_p10 = por %p105_p7, %p33_p0 }
   0xf   : > { %p725_p11 = por %p111_p8, %p39_p3  ;;  %s137_s26 = sand.u32 1, %s636_s14  }
  0x10   : > { %s892_s24 = scalar_select %p721_p10, 1, 0 }
  0x11   : > { %s893_s25 = scalar_select %p725_p11, 1, 0 }
  0x12   : > { %s474_s27 = sshll.u32 %s640_s15, 8  ;;  %s459_s28 = sshll.u32 %s137_s26, 7 }
  0x13   : > { %s734_s4 = scalar_lea.hbm %s884_s0, %s474_s27  ;;  %s141_s5 = scalar_lea.vmem [#allocation2], %s459_s28 }
  0x14   : > { %s148_s6 = sshll.u32 %s141_s5, 4  ;;  %p738_p12 = pnand %p504_p9, %p711_p5  ;;  %s742_s6 = int_to_ptr.vmem [resolvable:$true] %s148_s6 }
  0x15   : > { %s745_s8 = scalar_lea.sflag [#allocation3], %s137_s26  ;;  %s548_s9 = scalar_lea.hbm %s734_s4, 2048 }
  0x16   : > { %p549_p0 = scmp.ne.s32.totalorder %s734_s4, %s548_s9  ;;  %p550_p1 = pneg %p738_p12 }
  0x17   : > { %s553_s17 = scalar_lea.hbm %s884_s0, 8192  ;;  %p554_p4 = scmp.lt.s32.totalorder %s734_s4, %s884_s0 }
  0x18   : > { %p551_p2 = pnand %p550_p1, %p549_p0  ;;  %p555_p5 = scmp.lt.s32.totalorder %s553_s17, %s548_s9 }
  0x1a   : > { %p552_p3 = pneg %p551_p2  ;;  %p556_p7 = por %p555_p5, %p554_p4 }
  0x1c   : > { %p557_p8 = pnand %p556_p7, %p552_p3 }
  0x1e   : > { %560 = shalt.err (!%p557_p8)
}
  0x1f   : > { %s561_s22 = scalar_lea.vmem %s742_s6, 2048  ;;  %s642_s26 = smov [#allocation2]  }
  0x20   : > { %p562_p9 = scmp.ne.s32.totalorder %s742_s6, %s561_s22  ;;  %s566_s27 = sshll.u32 %s642_s26, 4  ;;  %s567_s27 = int_to_ptr.vmem [resolvable:$false] %s566_s27 }
  0x21   : > { %s568_s28 = scalar_lea.vmem %s567_s27, 4096  ;;  %p569_p2 = scmp.lt.s32.totalorder %s742_s6, %s567_s27 }
  0x22   : > { %p564_p13 = pnand %p562_p9, %p550_p1  ;;  %p570_p11 = scmp.lt.s32.totalorder %s568_s28, %s561_s22 }
  0x24   : > { %p565_p0 = pneg %p564_p13  ;;  %p571_p10 = por %p570_p11, %p569_p2 }
  0x26   : > { %p572_p6 = pnand %p571_p10, %p565_p0 }
  0x28   : > { %575 = shalt.err (!%p572_p6)
}
  0x29   : > { %s643_s29 = smov 1024   ;;  %s644_s30 = smov 256  }
  0x2a   : > { %s645_s5 = smov 16   ;;  %p156_p13 = scmp.lt.s32.totalorder %s640_s15, 5 }
  0x2b   : > { %499 = dma.hbm_to_vmem [thread:$0]  (!%p738_p12), %s734_s4, 2048, %s742_s6, %s745_s8, %s643_s29, %s644_s30, %s645_s5  }
  0x2c   : > { %p895_p1 = scmp.ge.s32.totalorder %s640_s15, 1 }
  0x2e   : > { %p157_p3 = pnand %p895_p1, %p156_p13 }
  0x2f   : > { %s770_s9 = sand.u32 (!%p157_p3), 1, %s632_s13   ;;  %p896_p6 = scmp.ne.s32.totalorder (!%p157_p3), %s891_s23, 0 }
  0x30   : > { %160 = sbr.rel (%p157_p3) target bundleno = 294 (0x126), region = 32  ;;  %s463_s10 = sshll.u32 (!%p157_p3), %s770_s9, 7 }
  0x31   : > { %s163_s11 = scalar_lea.sflag (!%p157_p3), [#allocation3], %s770_s9  ;;  %s774_s17 = scalar_lea.vmem (!%p157_p3), [#allocation2], %s463_s10 }
  0x35   : > { %619 = dma.done.wait (%p896_p6), %s163_s11, 2048  }
  0x36   : > { %621 = vsyncadd (%p896_p6), %s163_s11, 4294965248  ;;  %v646_v0 = vmov 0.0   ;;  %v647_v1 = vmov 0   ;;  %v210_v2 = vld [vmem:[%s774_s17 + $0x78] sm:$0xff]  ;;  %v209_v3 = vld [vmem:[%s774_s17 + $0x70] sm:$0xff]  ;;  %vm235_vm0 = vcmask 523264  }
  0x37   : > { %312 = vmatprep.mubr.f32.mxu0 %v646_v0  ;;  %324 = vmatprep.mubr.f32.mxu1 %v646_v0  ;;  %v208_v4 = vld [vmem:[%s774_s17 + $0x68] sm:$0xff]  ;;  %v207_v5 = vld [vmem:[%s774_s17 + $0x60] sm:$0xff]  ;;  %v206_v6 = vld [vmem:[%s774_s17 + $0x58] sm:$0xff]  ;;  %s475_s6 = sshll.u32 %s693_s16, 8  ;;  %s370_s19 = scalar_lea.sflag [#allocation4], %s770_s9 }
  0x38   : > { %547 = vset.pattern.permute.xlu1 %v647_v1  ;;  %546 = vset.pattern.permute.xlu0 %v647_v1  ;;  %v205_v7 = vld [vmem:[%s774_s17 + $0x50] sm:$0xff]  ;;  %v204_v8 = vld [vmem:[%s774_s17 + $0x48] sm:$0xff]  ;;  %v203_v9 = vld [vmem:[%s774_s17 + $0x40] sm:$0xff]  ;;  %s840_s8 = scalar_lea.hbm %s887_s3, %s475_s6  ;;  %p897_p11 = scmp.ne.s32.totalorder %s892_s24, 0 }
  0x39   : > { %264 = vmatprep.subr.mxu0 %v210_v2  ;;  %476 = vmatprep.subr.mxu1 %v210_v2  ;;  %v202_v10 = vld [vmem:[%s774_s17 + $0x38] sm:$0xff]  ;;  %v201_v11 = vld [vmem:[%s774_s17 + $0x30] sm:$0xff]  ;;  %v200_v12 = vld [vmem:[%s774_s17 + $0x28] sm:$0xff]  ;;  %s648_s22 = smov [#allocation5]  }
  0x3a   : > { %265 = vmatpush1.msra.mxu0 %v209_v3  ;;  %484 = vmatpush1.msra.mxu1 %v209_v3  ;;  %v199_v13 = vld [vmem:[%s774_s17 + $0x20] sm:$0xff]  ;;  %v198_v14 = vld [vmem:[%s774_s17 + $0x18] sm:$0xff]  ;;  %v197_v15 = vld [vmem:[%s774_s17 + $0x10] sm:$0xff]  ;;  %s580_s26 = sshll.u32 %s648_s22, 4  ;;  %s581_s26 = int_to_ptr.vmem [resolvable:$false] %s580_s26 }
  0x3b   : > { %266 = vmatprep.subr.mxu0 %v208_v4  ;;  %477 = vmatprep.subr.mxu1 %v208_v4  ;;  %v196_v16 = vld [vmem:[%s774_s17 + $0x8] sm:$0xff]  ;;  %v195_v17 = vld [vmem:[%s774_s17] sm:$0xff]  ;;  %v193_v19 = vld [vmem:[%s885_s1 + $0x10] sm:$0xff]  ;;  %s464_s17 = sshll.u32 %s770_s9, 6  ;;  %s582_s27 = scalar_lea.vmem %s581_s26, 2048 }
  0x3c   : > { %267 = vmatpush1.msra.mxu0 %v207_v5  ;;  %485 = vmatpush1.msra.mxu1 %v207_v5  ;;  %v191_v18 = vld [vmem:[%s885_s1] sm:$0xff]  ;;  %v213_v20 = vld [vmem:[%s886_s2 + $0x10] sm:$0xff]  ;;  %v192_v22 = vld [vmem:[%s885_s1 + $0x8] sm:$0xff]  ;;  %s825_s23 = scalar_lea.vmem [#allocation5], %s464_s17 }
  0x3d   : > { %268 = vmatprep.subr.mxu0 %v206_v6  ;;  %478 = vmatprep.subr.mxu1 %v206_v6  ;;  %v211_v21 = vld [vmem:[%s886_s2] sm:$0xff]  ;;  %v194_v23 = vld [vmem:[%s885_s1 + $0x18] sm:$0xff]  ;;  %v212_v25 = vld [vmem:[%s886_s2 + $0x8] sm:$0xff]  ;;  %s383_s4 = sshll.u32 %s825_s23, 4  ;;  %s833_s4 = int_to_ptr.vmem [resolvable:$true] %s383_s4 }
  0x3e   : > { %269 = vmatpush1.msra.mxu0 %v205_v7  ;;  %486 = vmatpush1.msra.mxu1 %v205_v7  ;;  %v214_v24 = vld [vmem:[%s886_s2 + $0x18] sm:$0xff]  ;;  %s576_s20 = scalar_lea.vmem %s833_s4, 1024  ;;  %p583_p5 = scmp.lt.s32.totalorder %s833_s4, %s581_s26 }
  0x3f   : > { %270 = vmatprep.subr.mxu0 %v204_v8  ;;  %479 = vmatprep.subr.mxu1 %v204_v8  ;;  %p577_p10 = scmp.ne.s32.totalorder %s833_s4, %s576_s20  ;;  %p584_p7 = scmp.lt.s32.totalorder %s582_s27, %s576_s20 }
  0x40   : > { %271 = vmatpush1.msra.mxu0 %v203_v9  ;;  %487 = vmatpush1.msra.mxu1 %v203_v9 }
  0x41   : > { %272 = vmatprep.subr.mxu0 %v202_v10  ;;  %480 = vmatprep.subr.mxu1 %v202_v10  ;;  %p578_p12 = pnand %p577_p10, %p897_p11  ;;  %p585_p8 = por %p584_p7, %p583_p5 }
  0x42   : > { %273 = vmatpush1.msra.mxu0 %v201_v11  ;;  %488 = vmatpush1.msra.mxu1 %v201_v11 }
  0x43   : > { %274 = vmatprep.subr.mxu0 %v200_v12  ;;  %481 = vmatprep.subr.mxu1 %v200_v12  ;;  %p579_p4 = pneg %p578_p12 }
  0x44   : > { %275 = vmatpush1.msra.mxu0 %v199_v13  ;;  %489 = vmatpush1.msra.mxu1 %v199_v13 }
  0x45   : > { %276 = vmatprep.subr.mxu0 %v198_v14  ;;  %482 = vmatprep.subr.mxu1 %v198_v14  ;;  %p586_p9 = pnand %p585_p8, %p579_p4 }
  0x46   : > { %277 = vmatpush1.msra.mxu0 %v197_v15  ;;  %490 = vmatpush1.msra.mxu1 %v197_v15 }
  0x47   : > { %278 = vmatprep.subr.mxu0 %v196_v16  ;;  %483 = vmatprep.subr.mxu1 %v196_v16 }
  0x48   : > { %279 = vmatpush1.msra.mxu0 %v195_v17  ;;  %491 = vmatpush1.msra.mxu1 %v195_v17 }
  0x49   : > { %465 = vmatmul.mubr.msk.f32.vlgmr.msra.gmra.mxu0 %vm235_vm0, %v191_v18  ;;  %467 = vmatmul.mubr.msk.f32.vlgmr.msra.gmra.mxu1 %vm235_vm0, %v193_v19 }
  0x4a   : > { %318 = vmatprep.mubr.f32.mxu0 %v646_v0  ;;  %330 = vmatprep.mubr.f32.mxu1 %v646_v0 }
  0x4b   : > { %227 = vperm.xlu1 %547, %v213_v20   ;;  %217 = vperm.xlu0 %546, %v211_v21  }
  0x4d   : > { %466 = vmatmul.mubr.msk.f32.gmra.mxu0 %vm235_vm0, %v192_v22  ;;  %468 = vmatmul.mubr.msk.f32.gmra.mxu1 %vm235_vm0, %v194_v23 }
  0x4f   : > { %232 = vperm.xlu1 %547, %v214_v24   ;;  %222 = vperm.xlu0 %546, %v212_v25  }
  0xc6   : > { %v228_v26 = vpop.permute.xlu1 %227  ;;  %v218_v27 = vpop.permute.xlu0 %217 }
  0xca   : > { %v233_v36 = vpop.permute.xlu1 %232  ;;  %v223_v37 = vpop.permute.xlu0 %222 }
 0x109   : > { %v314_v28 = vpop.f32.mrf.mxu0  ;;  %v326_v29 = vpop.f32.mrf.mxu1 }
 0x10a   : > { %v315_v30 = vadd.f32 %v314_v28, %v218_v27  ;;  %v327_v31 = vadd.f32 %v326_v29, %v228_v26 }
 0x10b   : > { %v316_v32 = vpop.f32.mrf.mxu0  ;;  %v328_v33 = vpop.f32.mrf.mxu1 }
 0x10c   : > { %vm337_vm1 = vcmp.ge.f32.partialorder %v315_v30, 0.0  ;;  %v345_v34 = vmul.f32 0.01, %v315_v30  ;;  %vm341_vm2 = vcmp.ge.f32.partialorder %v327_v31, 0.0  ;;  %v349_v35 = vmul.f32 0.01, %v327_v31 }
 0x10d   : > { %v317_v38 = vadd.f32 %v316_v32, %v218_v27  ;;  %v329_v39 = vadd.f32 %v328_v33, %v228_v26  ;;  %v320_v40 = vpop.f32.mrf.mxu0  ;;  %v332_v41 = vpop.f32.mrf.mxu1 }
 0x10e   : > { %v353_v42 = vsel %vm337_vm1, %v315_v30, %v345_v34  ;;  %v357_v43 = vsel %vm341_vm2, %v327_v31, %v349_v35  ;;  %v321_v44 = vadd.f32 %v320_v40, %v223_v37  ;;  %v333_v45 = vadd.f32 %v332_v41, %v233_v36 }
 0x10f   : > { %361 = vst [vmem:[%s825_s23] sm:$0xff] %v353_v42  ;;  %365 = vst [vmem:[%s825_s23 + $0x20] sm:$0xff] %v357_v43  ;;  %vm338_vm3 = vcmp.ge.f32.partialorder %v317_v38, 0.0  ;;  %v346_v46 = vmul.f32 0.01, %v317_v38  ;;  %vm342_vm4 = vcmp.ge.f32.partialorder %v329_v39, 0.0  ;;  %v322_v48 = vpop.f32.mrf.mxu0  ;;  %v334_v49 = vpop.f32.mrf.mxu1 }
 0x110   : > { %v350_v47 = vmul.f32 0.01, %v329_v39  ;;  %vm339_vm5 = vcmp.ge.f32.partialorder %v321_v44, 0.0  ;;  %v347_v50 = vmul.f32 0.01, %v321_v44  ;;  %vm343_vm6 = vcmp.ge.f32.partialorder %v333_v45, 0.0 }
 0x111   : > { %v351_v51 = vmul.f32 0.01, %v333_v45  ;;  %v354_v52 = vsel %vm338_vm3, %v317_v38, %v346_v46  ;;  %v323_v54 = vadd.f32 %v322_v48, %v223_v37  ;;  %v335_v55 = vadd.f32 %v334_v49, %v233_v36 }
 0x112   : > { %v358_v53 = vsel %vm342_vm4, %v329_v39, %v350_v47  ;;  %362 = vst [vmem:[%s825_s23 + $0x8] sm:$0xff] %v354_v52  ;;  %v355_v56 = vsel %vm339_vm5, %v321_v44, %v347_v50 }
 0x113   : > { %366 = vst [vmem:[%s825_s23 + $0x28] sm:$0xff] %v358_v53  ;;  %v359_v57 = vsel %vm343_vm6, %v333_v45, %v351_v51  ;;  %363 = vst [vmem:[%s825_s23 + $0x10] sm:$0xff] %v355_v56  ;;  %vm340_vm7 = vcmp.ge.f32.partialorder %v323_v54, 0.0  ;;  %v348_v58 = vmul.f32 0.01, %v323_v54  ;;  %vm344_vm8 = vcmp.ge.f32.partialorder %v335_v55, 0.0 }
 0x114   : > { %367 = vst [vmem:[%s825_s23 + $0x30] sm:$0xff] %v359_v57  ;;  %v352_v59 = vmul.f32 0.01, %v335_v55 }
 0x115   : > { %v356_v60 = vsel %vm340_vm7, %v323_v54, %v348_v58 }
 0x116   : > { %v360_v61 = vsel %vm344_vm8, %v335_v55, %v352_v59  ;;  %364 = vst [vmem:[%s825_s23 + $0x18] sm:$0xff] %v356_v60 }
 0x117   : > { %368 = vst [vmem:[%s825_s23 + $0x38] sm:$0xff] %v360_v61 }
 0x118   : > { %589 = shalt.err (!%p586_p9)
}
 0x119   : > { %s590_s28 = scalar_lea.hbm %s840_s8, 1024  ;;  %s594_s5 = scalar_lea.hbm %s887_s3, 4096 }
 0x11a   : > { %p591_p0 = scmp.ne.s32.totalorder %s840_s8, %s590_s28  ;;  %p595_p1 = scmp.lt.s32.totalorder %s840_s8, %s887_s3 }
 0x11b   : > { %p596_p3 = scmp.lt.s32.totalorder %s594_s5, %s590_s28 }
 0x11c   : > { %p592_p2 = pnand %p591_p0, %p897_p11 }
 0x11d   : > { %p597_p6 = por %p596_p3, %p595_p1 }
 0x11e   : > { %p593_p13 = pneg %p592_p2 }
 0x120   : > { %p598_p10 = pnand %p597_p6, %p593_p13 }
 0x122   : > { %601 = shalt.err (!%p598_p10)
}
 0x123   : > { %s649_s17 = smov 256   ;;  %s650_s23 = smov 1024  }
 0x124   : > { %s651_s6 = smov 16  }
 0x125   : > { %494 = dma.vmem_to_hbm [thread:$0]  (%p897_p11), %s833_s4, 1024, %s840_s8, %s370_s19, %s649_s17, %s650_s23, %s651_s6  }
 0x126 PF: > { %p505_p12 = scmp.ge.s32.totalorder %s640_s15, 2  ;;  %s398_s16 = sand.u32 1, %s628_s12  }
 0x127   : > { %p898_p4 = scmp.ne.s32.totalorder %s893_s25, 0  ;;  %s399_s7 = scalar_lea.sflag [#allocation4], %s398_s16 }
 0x129   : > { %p501_p5 = pnand %p505_p12, %p898_p4 }
 0x12b   : > { %p502_p7 = pneg %p501_p5 }
 0x12d   : > { %623 = dma.done.wait (%p502_p7), %s399_s7, 1024  }
 0x12e   : > { %625 = vsyncadd (%p502_p7), %s399_s7, 4294966272  ;;  %p16_p8 = scmp.ge.s32.totalorder %s697_s18, 6   ;;  %s899_s12 = smov %s632_s13 }
 0x12f   : > { %s900_s13 = smov %s636_s14  ;;  %s901_s14 = smov %s709_s21 }
 0x130   : > { %s902_s15 = smov %s697_s18  ;;  %18 = sbr.rel (!%p16_p8) target bundleno = 5 (0x5), region = 77 }
 0x135   :  { %404 = vsyncpa [#allocation3], 1 }
 0x136   :  { %406 = vsyncpa [#allocation3 + $0x1], 1 }
 0x137   :  { %407 = vsyncpa [#allocation4], 1 }
 0x138   :  { %409 = vsyncpa [#allocation4 + $0x1], 1 }

</bundles_post_ra>
